<compile_context>
chip_gen: v7x
topology: tpu7x:2x2x1
jax: 0.10.0
libtpu: 0.0.40
codegen_flags: <defaults>
</compile_context>

<pallas_src>
import math
from functools import partial

import numpy as np
import jax
import jax.numpy as jnp
from jax import lax
from jax.experimental import pallas as pl
from jax.experimental.pallas import tpu as pltpu


def _round_up(x, m):
    return ((x + m - 1) // m) * m


# ----------------------------------------------------------------------------
# Reference-faithful split/pad (graph sizes are host-side ints, exactly like the
# PyTorch reference which calls .tolist()).  Used only by the pure-JAX reference.
# ----------------------------------------------------------------------------
def split_and_batchify_graph_feats(batched_graph_feats, graph_sizes):
    sizes = [int(s) for s in np.asarray(graph_sizes).reshape(-1)]
    bsz = len(sizes)
    dim = batched_graph_feats.shape[-1]
    dtype = batched_graph_feats.dtype
    max_size, min_size = max(sizes), min(sizes)
    mask = np.ones((bsz, max_size), dtype=np.uint8)
    if min_size == max_size:
        return batched_graph_feats.reshape(bsz, max_size, dim), jnp.asarray(mask)
    chunks, offset = [], 0
    for i, l in enumerate(sizes):
        piece = batched_graph_feats[offset:offset + l]
        offset += l
        if l > max_size:
            piece = piece[:max_size]
        elif l < max_size:
            mask[i, l:] = 0
            piece = jnp.concatenate(
                [piece, jnp.zeros((max_size - l, dim), dtype=dtype)], axis=0)
        chunks.append(piece)
    return jnp.stack(chunks, axis=0), jnp.asarray(mask)


# ----------------------------------------------------------------------------
# Pallas kernel: for each (chunk c, row-tile t) grid step
#   P[b, j] = (gid[j] == b) ? wflat[j] : 0
#   o[c]   += P @ x_tile                          (f32, resident accumulator)
# ----------------------------------------------------------------------------
def _segment_weighted_sum_kernel(gid_ref, wflat_ref, x_ref, o_ref, *,
                                 tiles_per_chunk, tile_rows, total_rows, num_graphs):
    c = pl.program_id(0)          # parallel chunk (megacore axis)
    t = pl.program_id(1)          # reduction over row tiles within the chunk

    @pl.when(t == 0)
    def _init():
        o_ref[...] = jnp.zeros_like(o_ref)

    # Intended global row offset of this tile (before any index clamping).  Rows at or
    # beyond `total_rows` (partial boundary tile / clamped duplicate tiles) are masked so
    # unspecified out-of-bounds data can never reach the matmul.
    row0 = (c * tiles_per_chunk + t) * tile_rows
    valid = (lax.broadcasted_iota(jnp.int32, (tile_rows, 1), 0) + row0) < total_rows
    x = jnp.where(valid, x_ref[...].astype(jnp.float32), 0.0)              # (TN, D)

    gid = gid_ref[...]                                                      # (1, TN) int32
    wf = wflat_ref[...].astype(jnp.float32)                                 # (1, TN)
    b_iota = lax.broadcasted_iota(jnp.int32, (num_graphs, tile_rows), 0)    # (B, TN)
    p = jnp.where(gid == b_iota, wf, 0.0)                                   # one-hot * weight

    # Per-graph weighted reduction as one MXU matmul; accumulate directly into the
    # resident f32 output block (no scratch accumulator, no final copy).
    o_ref[...] += jnp.dot(p, x, precision=lax.Precision.HIGHEST,
                          preferred_element_type=jnp.float32)[None]


def _pick_row_tile(dim, num_graphs, max_rows_per_tile):
    # f32 VMEM footprint of one embedding row (lane axis padded to 128).
    row_fp = _round_up(max(dim, 128), 128) * 4
    try:
        kind = jax.devices()[0].device_kind.lower()
    except Exception:  # pragma: no cover - conservative default
        kind = ""
    big_vmem = ("v5" in kind) or ("v6" in kind)            # 128 MiB physical VMEM
    x_block_budget = (8 if big_vmem else 4) * 1024 * 1024  # per x block (double-buffered)
    tn = x_block_budget // row_fp
    tn = min(tn, (2 * 1024 * 1024) // (4 * max(num_graphs, 1)))  # one-hot P block <= 2 MiB
    tn = min(tn, 32768)
    if max_rows_per_tile is not None:
        tn = min(tn, int(max_rows_per_tile))
    return max(128, (tn // 128) * 128), row_fp


def graph_prompt_layer_weighted_forward(graph_embedding, graph_len, weight, *,
                                        max_rows_per_tile=None):
    """graph_embedding: (total_nodes, D); graph_len: per-graph sizes (host ints);
    weight: (1, max_n_num).  Returns (B, D) float32."""
    sizes = [int(s) for s in np.asarray(graph_len).reshape(-1)]
    bsz = len(sizes)
    n_max = max(sizes)
    total, dim = graph_embedding.shape
    if sum(sizes) != total:
        raise ValueError("graph_len does not sum to the number of node rows")
    if n_max > weight.shape[-1]:
        raise ValueError(f"max graph size {n_max} exceeds weight width {weight.shape[-1]}")
    if total >= 2 ** 31:
        raise ValueError("row indices must fit in int32")

    tn, row_fp = _pick_row_tile(dim, bsz, max_rows_per_tile)
    if total <= tn:
        tn, num_tiles, num_chunks = total, 1, 1           # exact single tile, zero padding
    else:
        num_tiles = -(-total // tn)
        num_chunks = 2 if num_tiles >= 2 else 1           # keep both v7x TensorCores busy
    tiles_per_chunk = -(-num_tiles // num_chunks)
    aux_len = num_tiles * tn                              # whole number of tiles

    # Tiny O(total) per-row side arrays (graph id + local node index) built host-side,
    # plus one small XLA gather for the per-row weight.  ~8 bytes/row of extra HBM traffic.
    gid_np = np.full((aux_len,), bsz, dtype=np.int32)     # bsz == "no graph" padding id
    loc_np = np.zeros((aux_len,), dtype=np.int32)
    off = 0
    for b, l in enumerate(sizes):
        gid_np[off:off + l] = b
        loc_np[off:off + l] = np.arange(l, dtype=np.int32)
        off += l
    gid = jnp.asarray(gid_np).reshape(1, aux_len)
    w_row = weight.reshape(-1)[:n_max].astype(jnp.float32)
    wflat = (jnp.take(w_row, jnp.asarray(loc_np), axis=0)
             * (jnp.asarray(gid_np) < bsz)).reshape(1, aux_len).astype(jnp.float32)

    # VMEM budget: 2x double-buffered x block + masked-x temp + one-hot P + resident out.
    x_fp = tn * row_fp
    p_fp = _round_up(bsz, 8) * _round_up(tn, 128) * 4
    aux_fp = 2 * 2 * 8 * _round_up(tn, 128) * 4
    out_fp = _round_up(bsz, 8) * _round_up(max(dim, 128), 128) * 4
    vmem_limit = min(64 << 20,
                     max(32 << 20, 3 * x_fp + p_fp + aux_fp + out_fp + (8 << 20)))

    last_tile = num_tiles - 1

    def row_index(c, t):
        # Clamp so no DMA ever starts past the end of the array; the clamped duplicate
        # tiles are fully masked in-kernel by the row-validity iota.
        return jnp.minimum(c * tiles_per_chunk + t, last_tile)

    kernel = partial(_segment_weighted_sum_kernel,
                     tiles_per_chunk=tiles_per_chunk, tile_rows=tn,
                     total_rows=total, num_graphs=bsz)

    # TODO(synk): sweep pipeline_mode=pl.Buffered(3) on the x spec for v7x once tile sizes
    #             are frozen (per-step DMA-issue latency is a larger fraction at 3.2 TB/s).
    partials = pl.pallas_call(
        kernel,
        out_shape=jax.ShapeDtypeStruct((num_chunks, bsz, dim), jnp.float32),
        grid=(num_chunks, tiles_per_chunk),
        in_specs=[
            pl.BlockSpec((1, tn), lambda c, t: (0, row_index(c, t))),       # gid
            pl.BlockSpec((1, tn), lambda c, t: (0, row_index(c, t))),       # wflat
            pl.BlockSpec((tn, dim), lambda c, t: (row_index(c, t), 0)),     # x rows
        ],
        out_specs=pl.BlockSpec((1, bsz, dim), lambda c, t: (c, 0, 0)),
        compiler_params=pltpu.CompilerParams(
            dimension_semantics=("parallel", "arbitrary"),
            vmem_limit_bytes=int(vmem_limit),
        ),
    )(gid, wflat, graph_embedding)

    # Tiny (C, B, D) partial-sum epilogue so the parallel chunks never race.
    return partials.sum(axis=0)


# ----------------------------------------------------------------------------
# Pure-JAX reference (mirrors the PyTorch forward) for a sanity check.
# ----------------------------------------------------------------------------
def _ref_forward(graph_embedding, graph_len, weight):
    padded, _ = split_and_batchify_graph_feats(graph_embedding, graph_len)
    B, N, D = padded.shape
    w = weight[0, :N]
    temp1 = jnp.ones((B, D, N), dtype=jnp.float32) * w          # (B, D, N)
    temp1 = jnp.transpose(temp1, (0, 2, 1))                     # (B, N, D)
    return jnp.sum(padded.astype(jnp.float32) * temp1, axis=1)  # (B, D)


if __name__ == "__main__":
    key = jax.random.PRNGKey(0)

    def xavier_uniform(k, shape, dtype=jnp.float32):
        fan_out, fan_in = shape
        bound = math.sqrt(6.0 / (fan_in + fan_out))
        return jax.random.uniform(k, shape, dtype=dtype, minval=-bound, maxval=bound)

    k1, k2, k3, k4 = jax.random.split(key, 4)

    # --- Test 1: tiny ragged batch (2 graphs of 8 and 5 nodes, D=32) -> single-tile path ---
    graph_len1 = np.array([8, 5], dtype=np.int64)
    emb1 = jax.random.normal(k1, (int(graph_len1.sum()), 32), dtype=jnp.float32)
    w1 = xavier_uniform(k2, (1, 16))
    out1 = jax.block_until_ready(graph_prompt_layer_weighted_forward(emb1, graph_len1, w1))
    ref1 = _ref_forward(emb1, graph_len1, w1)
    np.testing.assert_allclose(np.asarray(out1), np.asarray(ref1), rtol=1e-5, atol=1e-5)

    # --- Test 2: 10 ragged graphs with forced small row tiles -> exercises the multi-tile
    #     reduction, the two parallel chunks, the clamped duplicate tile and the masked
    #     partial boundary tile ---
    graph_len2 = np.array([300, 17, 64, 5, 120, 260, 33, 8, 77, 150], dtype=np.int64)
    emb2 = jax.random.normal(k3, (int(graph_len2.sum()), 64), dtype=jnp.float32)
    w2 = xavier_uniform(k4, (1, 320))
    out2 = jax.block_until_ready(
        graph_prompt_layer_weighted_forward(emb2, graph_len2, w2, max_rows_per_tile=256))
    ref2 = _ref_forward(emb2, graph_len2, w2)
    np.testing.assert_allclose(np.asarray(out2), np.asarray(ref2), rtol=1e-4, atol=1e-4)

    # --- Test 3: same data, default chip-derived tiling (single large tile) ---
    out3 = jax.block_until_ready(graph_prompt_layer_weighted_forward(emb2, graph_len2, w2))
    np.testing.assert_allclose(np.asarray(out3), np.asarray(ref2), rtol=1e-4, atol=1e-4)

    print("KERNEL_OK")
</pallas_src>

<mosaic_0001>
module attributes {stable_mosaic.version = 11 : i64} {
  func.func @_segment_weighted_sum_kernel(%arg0: i32, %arg1: i32, %arg2: memref<1x13xi32, #tpu.memory_space<vmem>>, %arg3: memref<1x13xf32, #tpu.memory_space<vmem>>, %arg4: memref<13x32xf32, #tpu.memory_space<vmem>>, %arg5: memref<1x2x32xf32, #tpu.memory_space<vmem>>) attributes {dimension_semantics = [#tpu.dimension_semantics<parallel>, #tpu.dimension_semantics<arbitrary>], iteration_bounds = array<i64: 1, 1>, scalar_prefetch = 0 : i64, scratch_operands = 0 : i64, tpu.core_type = #tpu.core_type<tc>, window_params = [{transform_indices = @transform_0, window_bounds = array<i64: 1, 13>}, {transform_indices = @transform_1, window_bounds = array<i64: 1, 13>}, {transform_indices = @transform_2, window_bounds = array<i64: 13, 32>}, {transform_indices = @transform_3, window_bounds = array<i64: 1, 2, 32>}]} {
    %c0_i32 = arith.constant 0 : i32
    %0 = arith.cmpi eq, %arg1, %c0_i32 : i32
    %1 = arith.extui %0 : i1 to i32
    %c0_i32_0 = arith.constant 0 : i32
    %2 = arith.cmpi ne, %1, %c0_i32_0 : i32
    scf.if %2 {
      %cst_15 = arith.constant 0.000000e+00 : f32
      %30 = vector.broadcast %cst_15 : f32 to vector<1x2x32xf32>
      %c0_16 = arith.constant 0 : index
      %c0_17 = arith.constant 0 : index
      %c0_18 = arith.constant 0 : index
      %31 = vector.load %arg5[%c0_16, %c0_17, %c0_18] : memref<1x2x32xf32, #tpu.memory_space<vmem>>, vector<1x2x32xf32>
      tpu.vector_store %arg5[%c0_16, %c0_17, %c0_18], %30 {strides = array<i32>} : memref<1x2x32xf32, #tpu.memory_space<vmem>>, vector<1x2x32xf32>,
    } else {
    }
    %c1_i32 = arith.constant 1 : i32
    %3 = arith.muli %arg0, %c1_i32 : i32
    %4 = arith.addi %3, %arg1 : i32
    %c13_i32 = arith.constant 13 : i32
    %5 = arith.muli %4, %c13_i32 : i32
    %6 = tpu.iota {dimensions = array<i32: 0>} : vector<13x1xi32>
    %7 = vector.broadcast %5 : i32 to vector<13x1xi32>
    %8 = arith.addi %6, %7 : vector<13x1xi32>
    %c13_i32_1 = arith.constant 13 : i32
    %9 = vector.broadcast %c13_i32_1 : i32 to vector<13x1xi32>
    %10 = arith.cmpi slt, %8, %9 : vector<13x1xi32>
    %c0 = arith.constant 0 : index
    %c0_2 = arith.constant 0 : index
    %11 = vector.load %arg4[%c0, %c0_2] : memref<13x32xf32, #tpu.memory_space<vmem>>, vector<13x32xf32>
    %cst = arith.constant 0.000000e+00 : f32
    %12 = vector.shape_cast %10 : vector<13x1xi1> to vector<13x1xi1>
    %13 = vector.broadcast %12 : vector<13x1xi1> to vector<13x32xi1>
    %14 = vector.broadcast %cst : f32 to vector<13x32xf32>
    %15 = arith.select %13, %11, %14 : vector<13x32xi1>, vector<13x32xf32>
    %c0_3 = arith.constant 0 : index
    %c0_4 = arith.constant 0 : index
    %16 = vector.load %arg2[%c0_3, %c0_4] : memref<1x13xi32, #tpu.memory_space<vmem>>, vector<1x13xi32>
    %c0_5 = arith.constant 0 : index
    %c0_6 = arith.constant 0 : index
    %17 = vector.load %arg3[%c0_5, %c0_6] : memref<1x13xf32, #tpu.memory_space<vmem>>, vector<1x13xf32>
    %18 = tpu.iota {dimensions = array<i32: 0>} : vector<2x13xi32>
    %19 = vector.broadcast %16 : vector<1x13xi32> to vector<2x13xi32>
    %20 = arith.cmpi eq, %19, %18 : vector<2x13xi32>
    %cst_7 = arith.constant 0.000000e+00 : f32
    %21 = vector.shape_cast %17 : vector<1x13xf32> to vector<1x13xf32>
    %22 = vector.broadcast %21 : vector<1x13xf32> to vector<2x13xf32>
    %23 = vector.broadcast %cst_7 : f32 to vector<2x13xf32>
    %24 = arith.select %20, %22, %23 : vector<2x13xi1>, vector<2x13xf32>
    %c0_8 = arith.constant 0 : index
    %c0_9 = arith.constant 0 : index
    %c0_10 = arith.constant 0 : index
    %25 = vector.load %arg5[%c0_8, %c0_9, %c0_10] : memref<1x2x32xf32, #tpu.memory_space<vmem>>, vector<1x2x32xf32>
    %cst_11 = arith.constant dense<0.000000e+00> : vector<2x32xf32>
    %26 = tpu.matmul %24, %15, %cst_11 {dimension_numbers = #tpu.dot_dimension_numbers<[1], [0], [0], [1], [0, 0, 1, 1], [], []>, precision = #tpu.contract_precision<fp32>} : vector<2x13xf32>, vector<13x32xf32>, vector<2x32xf32> -> vector<2x32xf32>
    %27 = vector.shape_cast %26 : vector<2x32xf32> to vector<1x2x32xf32>
    %28 = arith.addf %25, %27 : vector<1x2x32xf32>
    %c0_12 = arith.constant 0 : index
    %c0_13 = arith.constant 0 : index
    %c0_14 = arith.constant 0 : index
    %29 = vector.load %arg5[%c0_12, %c0_13, %c0_14] : memref<1x2x32xf32, #tpu.memory_space<vmem>>, vector<1x2x32xf32>
    tpu.vector_store %arg5[%c0_12, %c0_13, %c0_14], %28 {strides = array<i32>} : memref<1x2x32xf32, #tpu.memory_space<vmem>>, vector<1x2x32xf32>,
    return
  }
  func.func @transform_0(%arg0: i32, %arg1: i32) -> (i32, i32) {
    %c1_i32 = arith.constant 1 : i32
    %0 = arith.muli %arg0, %c1_i32 : i32
    %1 = arith.addi %0, %arg1 : i32
    %c0_i32 = arith.constant 0 : i32
    %2 = arith.minsi %1, %c0_i32 : i32
    %c0_i32_0 = arith.constant 0 : i32
    %c0_i32_1 = arith.constant 0 : i32
    return %c0_i32_0, %2 : i32, i32
  }
  func.func @transform_1(%arg0: i32, %arg1: i32) -> (i32, i32) {
    %c1_i32 = arith.constant 1 : i32
    %0 = arith.muli %arg0, %c1_i32 : i32
    %1 = arith.addi %0, %arg1 : i32
    %c0_i32 = arith.constant 0 : i32
    %2 = arith.minsi %1, %c0_i32 : i32
    %c0_i32_0 = arith.constant 0 : i32
    %c0_i32_1 = arith.constant 0 : i32
    return %c0_i32_0, %2 : i32, i32
  }
  func.func @transform_2(%arg0: i32, %arg1: i32) -> (i32, i32) {
    %c1_i32 = arith.constant 1 : i32
    %0 = arith.muli %arg0, %c1_i32 : i32
    %1 = arith.addi %0, %arg1 : i32
    %c0_i32 = arith.constant 0 : i32
    %2 = arith.minsi %1, %c0_i32 : i32
    %c0_i32_0 = arith.constant 0 : i32
    %c0_i32_1 = arith.constant 0 : i32
    return %2, %c0_i32_0 : i32, i32
  }
  func.func @transform_3(%arg0: i32, %arg1: i32) -> (i32, i32, i32) {
    %c0_i32 = arith.constant 0 : i32
    %c0_i32_0 = arith.constant 0 : i32
    %c0_i32_1 = arith.constant 0 : i32
    return %arg0, %c0_i32, %c0_i32_0 : i32, i32, i32
  }
}

</mosaic_0001>

<bundles_post_ra>
// kernel: tpu_custom_call.1
= control target key start
LH: loop header
LB: loop body
LE: loop exit
PB: predicated region body
PF: predicated region fallthrough
CT: control target
= control target key end

     0   :  { %8 = vsyncpa [#allocation3], 0  ;;  %s857_s0 = inlined_call_operand.hbm [shape: s32[1,13], index: 0, kind: input, shape index: {}]   ;;  %s858_s1 = inlined_call_operand.vmem [shape: f32[1,13], index: 1, kind: input, shape index: {}]   ;;  %s859_s2 = inlined_call_operand.hbm [shape: f32[13,32], index: 2, kind: input, shape index: {}]   ;;  %s860_s3 = inlined_call_operand.hbm [shape: f32[1,2,32], index: 3, kind: output, shape index: {}]  }
   0x1   :  { %9 = vsyncpa [#allocation6], 0 }
   0x2   :  { %10 = vsyncpa [#allocation4], 0  ;;  %s775_s12 = smov [#allocation2]   ;;  %s776_s14 = smov [#allocation5]  }
   0x3   :  { %s22_s13 = sshll.u32 %s775_s12, 4  ;;  %s48_s15 = sshll.u32 %s776_s14, 4  ;;  %s23_s13 = int_to_ptr.vmem [resolvable:$true] %s22_s13  ;;  %s803_s15 = int_to_ptr.vmem [resolvable:$true] %s48_s15 }
   0x4   :  { %s703_s18 = scalar_lea.hbm %s857_s0, 16 }
   0x5   :  { %p704_p0 = scmp.ne.s32.totalorder %s857_s0, %s703_s18  ;;  %p707_p1 = scmp.lt.u32.totalorder %s703_s18, %s857_s0 }
   0x7   :  { %p709_p2 = pnand %p707_p1, %p704_p0 }
   0x9   :  { %712 = shalt.err (!%p709_p2)
}
   0xa   :  { %s713_s23 = scalar_lea.vmem %s23_s13, 16  ;;  %s717_s24 = scalar_lea.vmem %s23_s13, 32 }
   0xb   :  { %p714_p3 = scmp.ne.s32.totalorder %s23_s13, %s713_s23  ;;  %p718_p4 = scmp.lt.s32.totalorder %s23_s13, %s23_s13 }
   0xc   :  { %p719_p5 = scmp.lt.s32.totalorder %s717_s24, %s713_s23 }
   0xe   :  { %p720_p6 = por %p719_p5, %p718_p4 }
  0x10   :  { %p721_p7 = pnand %p720_p6, %p714_p3 }
  0x12   :  { %724 = shalt.err (!%p721_p7)
}
  0x13   :  { %25 = dma.hbm_to_vmem [thread:$0]  %s857_s0, 16, %s23_s13, [#allocation3]  }
  0x14   :  { %s725_s29 = scalar_lea.hbm %s859_s2, 256 }
  0x15   :  { %p726_p8 = scmp.ne.s32.totalorder %s859_s2, %s725_s29  ;;  %p729_p9 = scmp.lt.u32.totalorder %s725_s29, %s859_s2 }
  0x17   :  { %p731_p10 = pnand %p729_p9, %p726_p8 }
  0x19   :  { %734 = shalt.err (!%p731_p10)
}
  0x1a   :  { %s735_s7 = scalar_lea.vmem %s803_s15, 256  ;;  %p740_p12 = scmp.lt.s32.totalorder %s803_s15, %s803_s15 }
  0x1b   :  { %p736_p11 = scmp.ne.s32.totalorder %s803_s15, %s735_s7  ;;  %p741_p13 = scmp.lt.s32.totalorder %s735_s7, %s735_s7 }
  0x1d   :  { %p742_p0 = por %p741_p13, %p740_p12 }
  0x1f   :  { %p743_p1 = pnand %p742_p0, %p736_p11 }
  0x21   :  { %746 = shalt.err (!%p743_p1)
}
  0x22   :  { %s777_s0 = smov 128   ;;  %s778_s8 = smov 8  }
  0x23   :  { %54 = dma.hbm_to_vmem [thread:$0]  %s859_s2, 256, %s803_s15, [#allocation6], %s777_s0, %s777_s0, %s778_s8  }
  0x24   :  { %769 = dma.done.wait [#allocation3], 16  }
  0x25   :  { %770 = vsyncadd [#allocation3], 4294967280 }
  0x26   :  { %771 = dma.done.wait [#allocation6], 256  }
  0x27   :  { %772 = vsyncadd [#allocation6], 4294967040  ;;  %vm87_vm0 = vcmask 254976   ;;  %v91_v0 = vlaneseq  ;;  %v779_v1 = vmov 0.0   ;;  %v780_v2 = vmov 0.0|0.0   ;;  %v99_v5 = vld [vmem:[#allocation5] sm:$0xff] }
  0x28   :  { %88 = vst.msk [vmem:[#allocation7] sm:$0x3] %vm87_vm0, %v779_v1  ;;  %677 = vmatprep.subr.bf16.mxu0 %v780_v2  ;;  %680 = vmatprep.subr.bf16.mxu1 %v780_v2  ;;  %vm781_vm1 = vmmov 0   ;;  %vm126_vm3 = vcmask 1044480   ;;  %v100_v6 = vld [vmem:[#allocation5 + $0x8] sm:$0x1f] }
  0x29   :  { %v92_v3 = vshrl.u32 %v91_v0, 7  ;;  %639 = vmatprep.mubr.msk.f32.mxu0 %vm781_vm1, %v779_v1  ;;  %646 = vmatprep.mubr.msk.f32.mxu1 %vm781_vm1, %v779_v1  ;;  %v615_v7 = vld [vmem:[#allocation2] ss:$0 sm:$0xff]  ;;  %vm122_vm4 = vcmask 105472   ;;  %v131_v9 = vand.u32 4294901760, %v99_v5 }
  0x2a   :  { %v616_v10 = vld [vmem:[%s858_s1] ss:$0 sm:$0xff]  ;;  %s782_s1 = smov [#allocation7]  }
  0x2b   :  { %v93_v4 = vadd.s32 8, %v92_v3  ;;  %vm113_vm5 = vcmp.eq.s32.totalorder %v615_v7, %v92_v3  ;;  %v209_v14 = vsub.f32 %v99_v5, %v131_v9  ;;  %s598_s12 = sshll.u32 %s782_s1, 4  ;;  %s599_s12 = int_to_ptr.vmem [resolvable:$true] %s598_s12 }
  0x2c   :  { %v120_v12 = vsel %vm113_vm5, %v616_v10, 0.0  ;;  %s747_s13 = scalar_lea.vmem %s599_s12, 32  ;;  %p752_p3 = scmp.lt.s32.totalorder %s599_s12, %s599_s12 }
  0x2d   :  { %vm98_vm2 = vcmp.lt.s32.totalorder %v93_v4, 13  ;;  %v124_v15 = vsel %vm122_vm4, %v120_v12, 0  ;;  %v210_v19 = vand.u32 4294901760, %v209_v14  ;;  %p748_p2 = scmp.ne.s32.totalorder %s599_s12, %s747_s13  ;;  %p753_p4 = scmp.lt.s32.totalorder %s747_s13, %s747_s13 }
  0x2e   :  { %v106_v8 = vsel %vm98_vm2, %v100_v6, 0.0  ;;  %v197_v16 = vand.u32 4294901760, %v124_v15 }
  0x2f   :  { %v128_v11 = vsel %vm126_vm3, %v106_v8, 0  ;;  %v211_v21 = vsub.f32 %v209_v14, %v210_v19  ;;  %v121_v46 = vld [vmem:[#allocation7] sm:$0x3]  ;;  %p754_p5 = por %p753_p4, %p752_p3 }
  0x30   :  { %v134_v13 = vand.u32 4294901760, %v128_v11  ;;  %v198_v20 = vsub.f32 %v124_v15, %v197_v16 }
  0x31   :  { %v212_v24 = vand.u32 4294901760, %v211_v21  ;;  %p755_p6 = pnand %p754_p5, %p748_p2 }
  0x32   :  { %v678_v17 = vpack.c.bf16 %v134_v13, %v131_v9  ;;  %v216_v18 = vsub.f32 %v128_v11, %v134_v13  ;;  %v199_v23 = vand.u32 4294901760, %v198_v20 }
  0x34   :  { %679 = vmatpush3.bf16.msra.mxu0 %v678_v17  ;;  %v217_v22 = vand.u32 4294901760, %v216_v18  ;;  %v200_v26 = vsub.f32 %v198_v20, %v199_v23  ;;  %v684_v28 = vpack.c.bf16 %v216_v18, %v209_v14 }
  0x35   :  { %683 = vmatprep.subr.bf16.mxu0 %v780_v2 }
  0x36   :  { %v218_v25 = vsub.f32 %v216_v18, %v217_v22  ;;  %v201_v29 = vand.u32 4294901760, %v200_v26  ;;  %v690_v31 = vpack.c.bf16 %v217_v22, %v210_v19 }
  0x38   :  { %v219_v27 = vand.u32 4294901760, %v218_v25  ;;  %640 = vmatmul.mubr.f32.vlgmr.msra.gmra.mrb[0].mxu0 %v201_v29 }
  0x39   :  { %685 = vmatpush3.bf16.msra.mxu0 %v684_v28  ;;  %653 = vmatprep.mubr.msk.f32.mxu0 %vm781_vm1, %v779_v1 }
  0x3a   :  { %v681_v30 = vpack.c.bf16 %v219_v27, %v212_v24  ;;  %689 = vmatprep.subr.bf16.mxu0 %v780_v2 }
  0x3c   :  { %682 = vmatpush3.bf16.msra.mxu1 %v681_v30  ;;  %654 = vmatmul.mubr.f32.vlgmr.msra.gmra.mrb[2].mxu0 %v198_v20 }
  0x3d   :  { %686 = vmatprep.subr.bf16.mxu1 %v780_v2  ;;  %691 = vmatpush3.bf16.msra.mxu0 %v690_v31 }
  0x3e   :  { %667 = vmatprep.mubr.msk.f32.mxu0 %vm781_vm1, %v779_v1 }
  0x3f   :  { %647 = vmatmul.mubr.f32.vlgmr.msra.gmra.mrb[0].mxu1 %v197_v16 }
  0x40   :  { %688 = vmatpush3.bf16.msra.mxu1 %v678_v17  ;;  %660 = vmatprep.mubr.msk.f32.mxu1 %vm781_vm1, %v779_v1 }
  0x41   :  { %692 = vmatprep.subr.bf16.mxu1 %v780_v2  ;;  %668 = vmatmul.mubr.f32.vlgmr.msra.gmra.mrb[4].mxu0 %v197_v16 }
  0x43   :  { %661 = vmatmul.mubr.f32.vlgmr.msra.gmra.mrb[2].mxu1 %v199_v23 }
  0x44   :  { %694 = vmatpush3.bf16.msra.mxu1 %v678_v17  ;;  %674 = vmatprep.mubr.msk.f32.mxu1 %vm781_vm1, %v779_v1 }
  0x47   :  { %675 = vmatmul.mubr.f32.vlgmr.msra.gmra.mrb[4].mxu1 %v197_v16 }
 0x10b   :  { %v203_v32 = vpop.f32.mrb[0].mxu0 }
 0x10c   :  { %v641_v33 = vpop.f32.mrb[1].mxu0 }
 0x10f   :  { %v360_v35 = vpop.f32.mrb[2].mxu0 }
 0x110   :  { %v655_v38 = vpop.f32.mrb[3].mxu0 }
 0x112   :  { %v284_v34 = vpop.f32.mrb[0].mxu1 }
 0x113   :  { %v285_v36 = vadd.f32 %v284_v34, %v203_v32  ;;  %v648_v37 = vpop.f32.mrb[1].mxu1 }
 0x114   :  { %v512_v43 = vpop.f32.mrb[4].mxu0 }
 0x115   :  { %v361_v39 = vadd.f32 %v360_v35, %v285_v36  ;;  %v669_v44 = vpop.f32.mrb[5].mxu0 }
 0x116   :  { %v435_v40 = vpop.f32.mrb[2].mxu1 }
 0x117   :  { %v436_v41 = vadd.f32 %v435_v40, %v361_v39  ;;  %v662_v42 = vpop.f32.mrb[3].mxu1 }
 0x119   :  { %v513_v45 = vadd.f32 %v512_v43, %v436_v41 }
 0x11a   :  { %v585_v47 = vpop.f32.mrb[4].mxu1 }
 0x11b   :  { %v586_v48 = vadd.f32 %v585_v47, %v513_v45  ;;  %v676_v49 = vpop.f32.mrb[5].mxu1 }
 0x11d   :  { %v589_v50 = vadd.f32 %v586_v48, %v121_v46 }
 0x11f   :  { %591 = vst.msk [vmem:[#allocation7] sm:$0x3] %vm87_vm0, %v589_v50 }
 0x120   :  { %758 = shalt.err (!%p755_p6)
}
 0x121   :  { %s759_s16 = scalar_lea.hbm %s860_s3, 32 }
 0x122   :  { %p760_p7 = scmp.ne.s32.totalorder %s860_s3, %s759_s16  ;;  %p763_p8 = scmp.lt.u32.totalorder %s759_s16, %s860_s3 }
 0x124   :  { %p765_p9 = pnand %p763_p8, %p760_p7 }
 0x126   :  { %768 = shalt.err (!%p765_p9)
}
 0x127   :  { %601 = dma.vmem_to_hbm [thread:$0]  %s599_s12, 32, %s860_s3, [#allocation4]  }
 0x128   :  { %773 = dma.done.wait [#allocation4], 32  }
 0x129   :  { %774 = vsyncadd [#allocation4], 4294967264 }
 0x12a   :  { %605 = vsyncpa [#allocation3], 1 }
 0x12b   :  { %606 = vsyncpa [#allocation6], 1 }
 0x12c   :  { %607 = vsyncpa [#allocation4], 1 }

</bundles_post_ra>
